<compile_context>
chip_gen: v7x
topology: tpu7x:2x2x1
jax: 0.10.0
libtpu: 0.0.40
codegen_flags: <defaults>
</compile_context>

<pallas_src>
import jax
import jax.numpy as jnp
from jax import lax
from jax.experimental import pallas as pl
from jax.experimental.pallas import tpu as pltpu


# ------------------------------- padding utils ------------------------------ #

def _round_up(n, m):
    return ((n + m - 1) // m) * m


def _pad_axis(x, axis, new_size, value=0):
    pad = new_size - x.shape[axis]
    if pad <= 0:
        return x
    widths = [(0, 0)] * x.ndim
    widths[axis] = (0, pad)
    return jnp.pad(x, widths, constant_values=value)


def _pad_gate_blocks(w, hp):
    """(..., 4*h) -> (..., 4*hp): zero-pad each PyTorch gate block (i, f, g, o) to hp lanes."""
    parts = jnp.split(w, 4, axis=-1)
    return jnp.concatenate([_pad_axis(p, -1, hp) for p in parts], axis=-1)


# ------------------------------- Pallas kernels ----------------------------- #

def _gate_nonlin(gates, c, hp):
    """PyTorch gate order i, f, g, o.  `gates` already contains x@W_ih + h@W_hh + b."""
    i = jax.nn.sigmoid(gates[:, 0 * hp:1 * hp])
    f = jax.nn.sigmoid(gates[:, 1 * hp:2 * hp])
    g = jnp.tanh(gates[:, 2 * hp:3 * hp])
    o = jax.nn.sigmoid(gates[:, 3 * hp:4 * hp])
    c_new = f * c + i * g
    h_new = o * jnp.tanh(c_new)
    return h_new, c_new


def _encoder_kernel(xproj_ref, whh_ref, h_ref, c_ref):
    """Fused encoder LSTM: entire source sequence in ONE kernel invocation.

    xproj_ref : (S, Bp, 4Hp)  pre-gathered  emb[src] @ W_ih + b   (hoisted out of recurrence)
    whh_ref   : (Hp, 4Hp)     recurrent weights, resident in VMEM
    Only the h @ W_hh matmul sits on the serial critical path.
    """
    S, bp, _ = xproj_ref.shape
    hp = whh_ref.shape[0]
    whh = whh_ref[...]

    def step(t, carry):
        h, c = carry
        gates = xproj_ref[t] + jnp.dot(h, whh, preferred_element_type=jnp.float32)
        return _gate_nonlin(gates, c, hp)

    h0 = jnp.zeros((bp, hp), jnp.float32)
    c0 = jnp.zeros((bp, hp), jnp.float32)
    h, c = lax.fori_loop(0, S, step, (h0, c0), unroll=True)
    h_ref[...] = h
    c_ref[...] = c


def _decoder_kernel(use_tf_ref,                      # (T,) int32 coins, SMEM (scalar prefetch)
                    tfx_ref,                          # (T-1, Bp, 4Hp) pre-gathered TF inputs
                    h0_ref, c0_ref,                   # (Bp, Hp) encoder state
                    xtab_ref,                         # (Vp, 4Hp) dec emb@W_ih + b (resident)
                    whh_ref,                          # (Hp, 4Hp) recurrent weights (resident)
                    wfc_ref, bfc_ref,                 # (Hp, Vp), (1, Vp) fc (resident)
                    out_ref):                         # (T-1, Bp, Vp) per-step logits
    """Fused decoder: all T-1 steps (input select, LSTM cell, fc, argmax) in ONE invocation."""
    nsteps, bp, _ = tfx_ref.shape
    hp = whh_ref.shape[0]
    vp = wfc_ref.shape[1]

    # Loop invariants hoisted once (JAX does not CSE broadcast_in_dim across iterations).
    whh = whh_ref[...]
    xtab = xtab_ref[...]
    wfc = wfc_ref[...]
    bfc = jnp.broadcast_to(bfc_ref[...], (bp, vp))
    lane = lax.broadcasted_iota(jnp.int32, (bp, vp), 1)

    def step(t, carry):
        h, c, onehot = carry
        # step 0 always uses target[:, 0]; otherwise this step's coin decides.
        sel = jnp.logical_or(t == 0, use_tf_ref[t] != 0)

        # Free-running input projection: previous-argmax one-hot @ (emb @ W_ih + b) table.
        # TODO(synk): at realistic vocab sizes gate this matmul behind the SMEM coin
        #             (pl.when into a scratch) or replace with per-row dynamic-slice gathers.
        fr_x = jnp.dot(onehot, xtab, preferred_element_type=jnp.float32)
        x_proj = jnp.where(sel, tfx_ref[t], fr_x)

        gates = x_proj + jnp.dot(h, whh, preferred_element_type=jnp.float32)
        h_new, c_new = _gate_nonlin(gates, c, hp)

        # fc projection (padded vocab bias columns are -1e30 -> never win the argmax).
        logits = jnp.dot(h_new, wfc, preferred_element_type=jnp.float32) + bfc
        out_ref[t] = logits                                   # lane-dense store

        # argmax with lowest-index tie-break (matches jnp.argmax), via max + index-min.
        m = jnp.max(logits, axis=1, keepdims=True)
        cand = jnp.where(logits == m, lane, vp)
        idx = jnp.min(cand, axis=1, keepdims=True)            # (Bp, 1) int32
        onehot_new = (lane == idx).astype(jnp.float32)        # carried for next step's input
        return h_new, c_new, onehot_new

    onehot0 = jnp.zeros((bp, vp), jnp.float32)
    lax.fori_loop(0, nsteps, step, (h0_ref[...], c0_ref[...], onehot0), unroll=True)


# ------------------------------ pallas_call wrappers ------------------------ #

_VMEM_LIMIT = 48 * 1024 * 1024   # above v5e/v6e scoped defaults, under v7x's 64 MiB physical


def _run_encoder(enc_xproj, p):
    _, Bp, _ = enc_xproj.shape
    Hp = p.Hp
    return pl.pallas_call(
        _encoder_kernel,
        out_shape=(jax.ShapeDtypeStruct((Bp, Hp), jnp.float32),
                   jax.ShapeDtypeStruct((Bp, Hp), jnp.float32)),
        compiler_params=pltpu.CompilerParams(vmem_limit_bytes=_VMEM_LIMIT),
    )(enc_xproj, p.enc_whh_p)


def _run_decoder(use_tf, tf_xproj, h0, c0, p):
    Tm1, Bp, _ = tf_xproj.shape
    Hp, Vp = p.Hp, p.Vp
    const2 = lambda i, tf: (0, 0)
    const3 = lambda i, tf: (0, 0, 0)
    grid_spec = pltpu.PrefetchScalarGridSpec(
        num_scalar_prefetch=1,                                 # teacher-forcing coins -> SMEM
        grid=(1,),                                             # all steps fused in one grid step
        in_specs=[
            pl.BlockSpec((Tm1, Bp, 4 * Hp), const3),           # teacher-forced x-projections
            pl.BlockSpec((Bp, Hp), const2),                    # encoder h
            pl.BlockSpec((Bp, Hp), const2),                    # encoder c
            pl.BlockSpec((Vp, 4 * Hp), const2),                # emb@W_ih+b table (resident)
            pl.BlockSpec((Hp, 4 * Hp), const2),                # W_hh (resident)
            pl.BlockSpec((Hp, Vp), const2),                    # fc weights (resident)
            pl.BlockSpec((1, Vp), const2),                     # fc bias (padded cols -1e30)
        ],
        out_specs=pl.BlockSpec((Tm1, Bp, Vp), const3),
    )
    return pl.pallas_call(
        _decoder_kernel,
        grid_spec=grid_spec,
        out_shape=jax.ShapeDtypeStruct((Tm1, Bp, Vp), jnp.float32),
        compiler_params=pltpu.CompilerParams(
            dimension_semantics=("arbitrary",),
            vmem_limit_bytes=_VMEM_LIMIT),
    )(use_tf, tf_xproj, h0, c0, p.dec_xproj_tab_p, p.dec_whh_p, p.fc_w_p, p.fc_b_p)


# -------------------------------- Seq2Seq model ----------------------------- #

class Seq2SeqParams:
    def __init__(self, key, src_vocab, tgt_vocab, emb, hidden):
        ks = jax.random.split(key, 10)
        s = 0.1
        # logical parameters (weights stored pre-transposed as (in, out); b == b_ih + b_hh)
        self.enc_emb = s * jax.random.normal(ks[0], (src_vocab, emb), jnp.float32)
        self.enc_wih = s * jax.random.normal(ks[1], (emb, 4 * hidden), jnp.float32)
        self.enc_whh = s * jax.random.normal(ks[2], (hidden, 4 * hidden), jnp.float32)
        self.enc_b = s * jax.random.normal(ks[3], (1, 4 * hidden), jnp.float32)
        self.dec_emb = s * jax.random.normal(ks[4], (tgt_vocab, emb), jnp.float32)
        self.dec_wih = s * jax.random.normal(ks[5], (emb, 4 * hidden), jnp.float32)
        self.dec_whh = s * jax.random.normal(ks[6], (hidden, 4 * hidden), jnp.float32)
        self.dec_b = s * jax.random.normal(ks[7], (1, 4 * hidden), jnp.float32)
        self.fc_w = s * jax.random.normal(ks[8], (hidden, tgt_vocab), jnp.float32)
        self.fc_b = s * jax.random.normal(ks[9], (1, tgt_vocab), jnp.float32)
        self.hidden, self.tgt_vocab, self.emb = hidden, tgt_vocab, emb

        # hardware-tile padded copies prepared ONCE (lanes = 128; gate blocks padded per-gate)
        Hp = _round_up(hidden, 128)
        Vp = _round_up(tgt_vocab, 128)
        self.Hp, self.Vp = Hp, Vp

        # Input projection hoisted out of the recurrences: per-vocab-row (emb @ W_ih + b),
        # gate-padded.  Per-step inputs become a cheap XLA row-gather of these tables.
        # TODO(synk): store resident tables in bfloat16 at realistic sizes (keep math f32).
        self.enc_xproj_tab = _pad_gate_blocks(self.enc_emb @ self.enc_wih + self.enc_b, Hp)
        self.dec_xproj_tab = _pad_gate_blocks(self.dec_emb @ self.dec_wih + self.dec_b, Hp)
        self.dec_xproj_tab_p = _pad_axis(self.dec_xproj_tab, 0, Vp)   # for in-kernel one-hot path

        self.enc_whh_p = _pad_axis(_pad_gate_blocks(self.enc_whh, Hp), 0, Hp)
        self.dec_whh_p = _pad_axis(_pad_gate_blocks(self.dec_whh, Hp), 0, Hp)
        self.fc_w_p = _pad_axis(_pad_axis(self.fc_w, 1, Vp), 0, Hp)
        # -1e30 sentinel is fine in f32/bf16; with a vocab-tiled fc prefer masking instead.
        self.fc_b_p = _pad_axis(self.fc_b, 1, Vp, value=-1e30)


def seq2seq_forward(params, source, target, teacher_forcing_ratio=0.5, tf_key=None):
    """Mirrors Seq2Seq.forward: outputs[:, 0, :] stays zero; steps 1..T-1 are filled."""
    if tf_key is None:
        tf_key = jax.random.PRNGKey(0)
    B, S = source.shape
    _, T = target.shape
    V = params.tgt_vocab
    Bp = _round_up(B, 8)

    # one scalar coin per decode step (mirrors `torch.rand(1).item()` per iteration)
    coins = jax.random.uniform(tf_key, (T,))
    use_tf = (coins < teacher_forcing_ratio).astype(jnp.int32)

    # ---- encoder: embedding + input projection as ONE gather, then ONE fused Pallas call ----
    src_p = _pad_axis(source.astype(jnp.int32), 0, Bp)                      # (Bp, S)
    enc_xproj = jnp.transpose(jnp.take(params.enc_xproj_tab, src_p, axis=0),
                              (1, 0, 2))                                    # (S, Bp, 4Hp)
    h_enc, c_enc = _run_encoder(enc_xproj, params)                          # (Bp, Hp) each

    # ---- decoder: pre-gather teacher-forced input projections, ONE fused Pallas call ----
    tgt_p = _pad_axis(target.astype(jnp.int32), 0, Bp)                      # (Bp, T)
    tf_xproj = jnp.transpose(jnp.take(params.dec_xproj_tab, tgt_p[:, :T - 1], axis=0),
                             (1, 0, 2))                                     # (T-1, Bp, 4Hp)
    logits = _run_decoder(use_tf, tf_xproj, h_enc, c_enc, params)           # (T-1, Bp, Vp)

    out = jnp.transpose(logits, (1, 0, 2))[:B, :, :V]                       # (B, T-1, V)
    return jnp.concatenate([jnp.zeros((B, 1, V), jnp.float32), out], axis=1)


# ----------------------------- pure-JAX reference --------------------------- #

def _ref_lstm_cell(x, h, c, wih, whh, b):
    H = h.shape[-1]
    gates = x @ wih + h @ whh + b
    i = jax.nn.sigmoid(gates[:, 0 * H:1 * H])
    f = jax.nn.sigmoid(gates[:, 1 * H:2 * H])
    g = jnp.tanh(gates[:, 2 * H:3 * H])
    o = jax.nn.sigmoid(gates[:, 3 * H:4 * H])
    c_new = f * c + i * g
    return o * jnp.tanh(c_new), c_new


def reference_forward(p, source, target, teacher_forcing_ratio=0.5, tf_key=None):
    if tf_key is None:
        tf_key = jax.random.PRNGKey(0)
    B, S = source.shape
    _, T = target.shape
    coins = jax.random.uniform(tf_key, (T,))
    use_tf = coins < teacher_forcing_ratio

    h = jnp.zeros((B, p.hidden), jnp.float32)
    c = jnp.zeros_like(h)
    for t in range(S):
        x = jnp.take(p.enc_emb, source[:, t], axis=0)
        h, c = _ref_lstm_cell(x, h, c, p.enc_wih, p.enc_whh, p.enc_b)

    outs = [jnp.zeros((B, p.tgt_vocab), jnp.float32)]
    inp = target[:, 0]
    for t in range(1, T):
        x = jnp.take(p.dec_emb, inp, axis=0)
        h, c = _ref_lstm_cell(x, h, c, p.dec_wih, p.dec_whh, p.dec_b)
        logits = h @ p.fc_w + p.fc_b
        outs.append(logits)
        top1 = jnp.argmax(logits, axis=1).astype(target.dtype)
        inp = jnp.where(use_tf[t], target[:, t], top1)
    return jnp.stack(outs, axis=1)


# ------------------------------------ main ----------------------------------- #

if __name__ == "__main__":
    B, S, T = 2, 6, 8
    EMB, HID = 32, 32
    SRC_V, TGT_V = 16, 16

    key = jax.random.PRNGKey(0)
    k_par, k_src, k_tgt, k_tf = jax.random.split(key, 4)

    params = Seq2SeqParams(k_par, SRC_V, TGT_V, EMB, HID)
    source = jax.random.randint(k_src, (B, S), 0, SRC_V, dtype=jnp.int32)
    target = jax.random.randint(k_tgt, (B, T), 0, TGT_V, dtype=jnp.int32)

    # TF = 1.0: pure teacher-forcing path (no argmax-dependent divergence) vs reference.
    out_tf = seq2seq_forward(params, source, target, teacher_forcing_ratio=1.0, tf_key=k_tf)
    ref_tf = reference_forward(params, source, target, teacher_forcing_ratio=1.0, tf_key=k_tf)
    jax.block_until_ready((out_tf, ref_tf))
    assert out_tf.shape == (B, T, TGT_V)
    assert bool(jnp.all(out_tf[:, 0, :] == 0.0))
    assert bool(jnp.allclose(out_tf, ref_tf, atol=2e-2, rtol=2e-2))

    # TF = 0.0: fully free-running -> every step exercises the in-kernel argmax + select path.
    out_fr = seq2seq_forward(params, source, target, teacher_forcing_ratio=0.0, tf_key=k_tf)
    ref_fr = reference_forward(params, source, target, teacher_forcing_ratio=0.0, tf_key=k_tf)
    jax.block_until_ready((out_fr, ref_fr))
    assert bool(jnp.allclose(out_fr, ref_fr, atol=2e-2, rtol=2e-2))

    # TF = 0.5: mixed path (same coins as the module would draw), sanity-checked for shape.
    out = seq2seq_forward(params, source, target, teacher_forcing_ratio=0.5, tf_key=k_tf)
    jax.block_until_ready(out)
    assert out.shape == (B, T, TGT_V)
    assert bool(jnp.all(out[:, 0, :] == 0.0))
    print("KERNEL_OK")
</pallas_src>

<mosaic_0001>
module attributes {stable_mosaic.version = 11 : i64} {
  func.func @_encoder_kernel(%arg0: memref<6x8x512xf32, #tpu.memory_space<vmem>>, %arg1: memref<128x512xf32, #tpu.memory_space<vmem>>, %arg2: memref<8x128xf32, #tpu.memory_space<vmem>>, %arg3: memref<8x128xf32, #tpu.memory_space<vmem>>) attributes {dimension_semantics = [], scalar_prefetch = 0 : i64, scratch_operands = 0 : i64, tpu.core_type = #tpu.core_type<tc>} {
    %c0 = arith.constant 0 : index
    %c0_0 = arith.constant 0 : index
    %0 = vector.load %arg1[%c0, %c0_0] : memref<128x512xf32, #tpu.memory_space<vmem>>, vector<128x512xf32>
    %cst = arith.constant 0.000000e+00 : f32
    %1 = vector.broadcast %cst : f32 to vector<8x128xf32>
    %cst_1 = arith.constant 0.000000e+00 : f32
    %2 = vector.broadcast %cst_1 : f32 to vector<8x128xf32>
    %c0_i32 = arith.constant 0 : i32
    %3 = arith.index_cast %c0_i32 : i32 to index
    %c0_2 = arith.constant 0 : index
    %c0_3 = arith.constant 0 : index
    %4 = vector.load %arg0[%3, %c0_2, %c0_3] : memref<6x8x512xf32, #tpu.memory_space<vmem>>, vector<1x8x512xf32>
    %5 = vector.shape_cast %4 : vector<1x8x512xf32> to vector<8x512xf32>
    %cst_4 = arith.constant dense<0.000000e+00> : vector<8x512xf32>
    %6 = tpu.matmul %1, %0, %cst_4 {dimension_numbers = #tpu.dot_dimension_numbers<[1], [0], [0], [1], [0, 0, 1, 1], [], []>} : vector<8x128xf32>, vector<128x512xf32>, vector<8x512xf32> -> vector<8x512xf32>
    %7 = arith.addf %5, %6 : vector<8x512xf32>
    %8 = vector.extract_strided_slice %7 {offsets = [0, 0], sizes = [8, 128], strides = [1, 1]} : vector<8x512xf32> to vector<8x128xf32>
    %9 = arith.negf %8 : vector<8x128xf32>
    %10 = math.exp %9 : vector<8x128xf32>
    %cst_5 = arith.constant 1.000000e+00 : f32
    %11 = vector.broadcast %cst_5 : f32 to vector<8x128xf32>
    %12 = arith.addf %11, %10 : vector<8x128xf32>
    %13 = arith.divf %11, %12 : vector<8x128xf32>
    %14 = vector.extract_strided_slice %7 {offsets = [0, 128], sizes = [8, 128], strides = [1, 1]} : vector<8x512xf32> to vector<8x128xf32>
    %15 = arith.negf %14 : vector<8x128xf32>
    %16 = math.exp %15 : vector<8x128xf32>
    %cst_6 = arith.constant 1.000000e+00 : f32
    %17 = vector.broadcast %cst_6 : f32 to vector<8x128xf32>
    %18 = arith.addf %17, %16 : vector<8x128xf32>
    %19 = arith.divf %17, %18 : vector<8x128xf32>
    %20 = vector.extract_strided_slice %7 {offsets = [0, 256], sizes = [8, 128], strides = [1, 1]} : vector<8x512xf32> to vector<8x128xf32>
    %21 = math.tanh %20 : vector<8x128xf32>
    %22 = vector.extract_strided_slice %7 {offsets = [0, 384], sizes = [8, 128], strides = [1, 1]} : vector<8x512xf32> to vector<8x128xf32>
    %23 = arith.negf %22 : vector<8x128xf32>
    %24 = math.exp %23 : vector<8x128xf32>
    %cst_7 = arith.constant 1.000000e+00 : f32
    %25 = vector.broadcast %cst_7 : f32 to vector<8x128xf32>
    %26 = arith.addf %25, %24 : vector<8x128xf32>
    %27 = arith.divf %25, %26 : vector<8x128xf32>
    %28 = arith.mulf %19, %2 : vector<8x128xf32>
    %29 = arith.mulf %13, %21 : vector<8x128xf32>
    %30 = arith.addf %28, %29 : vector<8x128xf32>
    %31 = math.tanh %30 : vector<8x128xf32>
    %32 = arith.mulf %27, %31 : vector<8x128xf32>
    %c1_i32 = arith.constant 1 : i32
    %33 = arith.index_cast %c1_i32 : i32 to index
    %c0_8 = arith.constant 0 : index
    %c0_9 = arith.constant 0 : index
    %34 = vector.load %arg0[%33, %c0_8, %c0_9] : memref<6x8x512xf32, #tpu.memory_space<vmem>>, vector<1x8x512xf32>
    %35 = vector.shape_cast %34 : vector<1x8x512xf32> to vector<8x512xf32>
    %cst_10 = arith.constant dense<0.000000e+00> : vector<8x512xf32>
    %36 = tpu.matmul %32, %0, %cst_10 {dimension_numbers = #tpu.dot_dimension_numbers<[1], [0], [0], [1], [0, 0, 1, 1], [], []>} : vector<8x128xf32>, vector<128x512xf32>, vector<8x512xf32> -> vector<8x512xf32>
    %37 = arith.addf %35, %36 : vector<8x512xf32>
    %38 = vector.extract_strided_slice %37 {offsets = [0, 0], sizes = [8, 128], strides = [1, 1]} : vector<8x512xf32> to vector<8x128xf32>
    %39 = arith.negf %38 : vector<8x128xf32>
    %40 = math.exp %39 : vector<8x128xf32>
    %cst_11 = arith.constant 1.000000e+00 : f32
    %41 = vector.broadcast %cst_11 : f32 to vector<8x128xf32>
    %42 = arith.addf %41, %40 : vector<8x128xf32>
    %43 = arith.divf %41, %42 : vector<8x128xf32>
    %44 = vector.extract_strided_slice %37 {offsets = [0, 128], sizes = [8, 128], strides = [1, 1]} : vector<8x512xf32> to vector<8x128xf32>
    %45 = arith.negf %44 : vector<8x128xf32>
    %46 = math.exp %45 : vector<8x128xf32>
    %cst_12 = arith.constant 1.000000e+00 : f32
    %47 = vector.broadcast %cst_12 : f32 to vector<8x128xf32>
    %48 = arith.addf %47, %46 : vector<8x128xf32>
    %49 = arith.divf %47, %48 : vector<8x128xf32>
    %50 = vector.extract_strided_slice %37 {offsets = [0, 256], sizes = [8, 128], strides = [1, 1]} : vector<8x512xf32> to vector<8x128xf32>
    %51 = math.tanh %50 : vector<8x128xf32>
    %52 = vector.extract_strided_slice %37 {offsets = [0, 384], sizes = [8, 128], strides = [1, 1]} : vector<8x512xf32> to vector<8x128xf32>
    %53 = arith.negf %52 : vector<8x128xf32>
    %54 = math.exp %53 : vector<8x128xf32>
    %cst_13 = arith.constant 1.000000e+00 : f32
    %55 = vector.broadcast %cst_13 : f32 to vector<8x128xf32>
    %56 = arith.addf %55, %54 : vector<8x128xf32>
    %57 = arith.divf %55, %56 : vector<8x128xf32>
    %58 = arith.mulf %49, %30 : vector<8x128xf32>
    %59 = arith.mulf %43, %51 : vector<8x128xf32>
    %60 = arith.addf %58, %59 : vector<8x128xf32>
    %61 = math.tanh %60 : vector<8x128xf32>
    %62 = arith.mulf %57, %61 : vector<8x128xf32>
    %c2_i32 = arith.constant 2 : i32
    %63 = arith.index_cast %c2_i32 : i32 to index
    %c0_14 = arith.constant 0 : index
    %c0_15 = arith.constant 0 : index
    %64 = vector.load %arg0[%63, %c0_14, %c0_15] : memref<6x8x512xf32, #tpu.memory_space<vmem>>, vector<1x8x512xf32>
    %65 = vector.shape_cast %64 : vector<1x8x512xf32> to vector<8x512xf32>
    %cst_16 = arith.constant dense<0.000000e+00> : vector<8x512xf32>
    %66 = tpu.matmul %62, %0, %cst_16 {dimension_numbers = #tpu.dot_dimension_numbers<[1], [0], [0], [1], [0, 0, 1, 1], [], []>} : vector<8x128xf32>, vector<128x512xf32>, vector<8x512xf32> -> vector<8x512xf32>
    %67 = arith.addf %65, %66 : vector<8x512xf32>
    %68 = vector.extract_strided_slice %67 {offsets = [0, 0], sizes = [8, 128], strides = [1, 1]} : vector<8x512xf32> to vector<8x128xf32>
    %69 = arith.negf %68 : vector<8x128xf32>
    %70 = math.exp %69 : vector<8x128xf32>
    %cst_17 = arith.constant 1.000000e+00 : f32
    %71 = vector.broadcast %cst_17 : f32 to vector<8x128xf32>
    %72 = arith.addf %71, %70 : vector<8x128xf32>
    %73 = arith.divf %71, %72 : vector<8x128xf32>
    %74 = vector.extract_strided_slice %67 {offsets = [0, 128], sizes = [8, 128], strides = [1, 1]} : vector<8x512xf32> to vector<8x128xf32>
    %75 = arith.negf %74 : vector<8x128xf32>
    %76 = math.exp %75 : vector<8x128xf32>
    %cst_18 = arith.constant 1.000000e+00 : f32
    %77 = vector.broadcast %cst_18 : f32 to vector<8x128xf32>
    %78 = arith.addf %77, %76 : vector<8x128xf32>
    %79 = arith.divf %77, %78 : vector<8x128xf32>
    %80 = vector.extract_strided_slice %67 {offsets = [0, 256], sizes = [8, 128], strides = [1, 1]} : vector<8x512xf32> to vector<8x128xf32>
    %81 = math.tanh %80 : vector<8x128xf32>
    %82 = vector.extract_strided_slice %67 {offsets = [0, 384], sizes = [8, 128], strides = [1, 1]} : vector<8x512xf32> to vector<8x128xf32>
    %83 = arith.negf %82 : vector<8x128xf32>
    %84 = math.exp %83 : vector<8x128xf32>
    %cst_19 = arith.constant 1.000000e+00 : f32
    %85 = vector.broadcast %cst_19 : f32 to vector<8x128xf32>
    %86 = arith.addf %85, %84 : vector<8x128xf32>
    %87 = arith.divf %85, %86 : vector<8x128xf32>
    %88 = arith.mulf %79, %60 : vector<8x128xf32>
    %89 = arith.mulf %73, %81 : vector<8x128xf32>
    %90 = arith.addf %88, %89 : vector<8x128xf32>
    %91 = math.tanh %90 : vector<8x128xf32>
    %92 = arith.mulf %87, %91 : vector<8x128xf32>
    %c3_i32 = arith.constant 3 : i32
    %93 = arith.index_cast %c3_i32 : i32 to index
    %c0_20 = arith.constant 0 : index
    %c0_21 = arith.constant 0 : index
    %94 = vector.load %arg0[%93, %c0_20, %c0_21] : memref<6x8x512xf32, #tpu.memory_space<vmem>>, vector<1x8x512xf32>
    %95 = vector.shape_cast %94 : vector<1x8x512xf32> to vector<8x512xf32>
    %cst_22 = arith.constant dense<0.000000e+00> : vector<8x512xf32>
    %96 = tpu.matmul %92, %0, %cst_22 {dimension_numbers = #tpu.dot_dimension_numbers<[1], [0], [0], [1], [0, 0, 1, 1], [], []>} : vector<8x128xf32>, vector<128x512xf32>, vector<8x512xf32> -> vector<8x512xf32>
    %97 = arith.addf %95, %96 : vector<8x512xf32>
    %98 = vector.extract_strided_slice %97 {offsets = [0, 0], sizes = [8, 128], strides = [1, 1]} : vector<8x512xf32> to vector<8x128xf32>
    %99 = arith.negf %98 : vector<8x128xf32>
    %100 = math.exp %99 : vector<8x128xf32>
    %cst_23 = arith.constant 1.000000e+00 : f32
    %101 = vector.broadcast %cst_23 : f32 to vector<8x128xf32>
    %102 = arith.addf %101, %100 : vector<8x128xf32>
    %103 = arith.divf %101, %102 : vector<8x128xf32>
    %104 = vector.extract_strided_slice %97 {offsets = [0, 128], sizes = [8, 128], strides = [1, 1]} : vector<8x512xf32> to vector<8x128xf32>
    %105 = arith.negf %104 : vector<8x128xf32>
    %106 = math.exp %105 : vector<8x128xf32>
    %cst_24 = arith.constant 1.000000e+00 : f32
    %107 = vector.broadcast %cst_24 : f32 to vector<8x128xf32>
    %108 = arith.addf %107, %106 : vector<8x128xf32>
    %109 = arith.divf %107, %108 : vector<8x128xf32>
    %110 = vector.extract_strided_slice %97 {offsets = [0, 256], sizes = [8, 128], strides = [1, 1]} : vector<8x512xf32> to vector<8x128xf32>
    %111 = math.tanh %110 : vector<8x128xf32>
    %112 = vector.extract_strided_slice %97 {offsets = [0, 384], sizes = [8, 128], strides = [1, 1]} : vector<8x512xf32> to vector<8x128xf32>
    %113 = arith.negf %112 : vector<8x128xf32>
    %114 = math.exp %113 : vector<8x128xf32>
    %cst_25 = arith.constant 1.000000e+00 : f32
    %115 = vector.broadcast %cst_25 : f32 to vector<8x128xf32>
    %116 = arith.addf %115, %114 : vector<8x128xf32>
    %117 = arith.divf %115, %116 : vector<8x128xf32>
    %118 = arith.mulf %109, %90 : vector<8x128xf32>
    %119 = arith.mulf %103, %111 : vector<8x128xf32>
    %120 = arith.addf %118, %119 : vector<8x128xf32>
    %121 = math.tanh %120 : vector<8x128xf32>
    %122 = arith.mulf %117, %121 : vector<8x128xf32>
    %c4_i32 = arith.constant 4 : i32
    %123 = arith.index_cast %c4_i32 : i32 to index
    %c0_26 = arith.constant 0 : index
    %c0_27 = arith.constant 0 : index
    %124 = vector.load %arg0[%123, %c0_26, %c0_27] : memref<6x8x512xf32, #tpu.memory_space<vmem>>, vector<1x8x512xf32>
    %125 = vector.shape_cast %124 : vector<1x8x512xf32> to vector<8x512xf32>
    %cst_28 = arith.constant dense<0.000000e+00> : vector<8x512xf32>
    %126 = tpu.matmul %122, %0, %cst_28 {dimension_numbers = #tpu.dot_dimension_numbers<[1], [0], [0], [1], [0, 0, 1, 1], [], []>} : vector<8x128xf32>, vector<128x512xf32>, vector<8x512xf32> -> vector<8x512xf32>
    %127 = arith.addf %125, %126 : vector<8x512xf32>
    %128 = vector.extract_strided_slice %127 {offsets = [0, 0], sizes = [8, 128], strides = [1, 1]} : vector<8x512xf32> to vector<8x128xf32>
    %129 = arith.negf %128 : vector<8x128xf32>
    %130 = math.exp %129 : vector<8x128xf32>
    %cst_29 = arith.constant 1.000000e+00 : f32
    %131 = vector.broadcast %cst_29 : f32 to vector<8x128xf32>
    %132 = arith.addf %131, %130 : vector<8x128xf32>
    %133 = arith.divf %131, %132 : vector<8x128xf32>
    %134 = vector.extract_strided_slice %127 {offsets = [0, 128], sizes = [8, 128], strides = [1, 1]} : vector<8x512xf32> to vector<8x128xf32>
    %135 = arith.negf %134 : vector<8x128xf32>
    %136 = math.exp %135 : vector<8x128xf32>
    %cst_30 = arith.constant 1.000000e+00 : f32
    %137 = vector.broadcast %cst_30 : f32 to vector<8x128xf32>
    %138 = arith.addf %137, %136 : vector<8x128xf32>
    %139 = arith.divf %137, %138 : vector<8x128xf32>
    %140 = vector.extract_strided_slice %127 {offsets = [0, 256], sizes = [8, 128], strides = [1, 1]} : vector<8x512xf32> to vector<8x128xf32>
    %141 = math.tanh %140 : vector<8x128xf32>
    %142 = vector.extract_strided_slice %127 {offsets = [0, 384], sizes = [8, 128], strides = [1, 1]} : vector<8x512xf32> to vector<8x128xf32>
    %143 = arith.negf %142 : vector<8x128xf32>
    %144 = math.exp %143 : vector<8x128xf32>
    %cst_31 = arith.constant 1.000000e+00 : f32
    %145 = vector.broadcast %cst_31 : f32 to vector<8x128xf32>
    %146 = arith.addf %145, %144 : vector<8x128xf32>
    %147 = arith.divf %145, %146 : vector<8x128xf32>
    %148 = arith.mulf %139, %120 : vector<8x128xf32>
    %149 = arith.mulf %133, %141 : vector<8x128xf32>
    %150 = arith.addf %148, %149 : vector<8x128xf32>
    %151 = math.tanh %150 : vector<8x128xf32>
    %152 = arith.mulf %147, %151 : vector<8x128xf32>
    %c5_i32 = arith.constant 5 : i32
    %153 = arith.index_cast %c5_i32 : i32 to index
    %c0_32 = arith.constant 0 : index
    %c0_33 = arith.constant 0 : index
    %154 = vector.load %arg0[%153, %c0_32, %c0_33] : memref<6x8x512xf32, #tpu.memory_space<vmem>>, vector<1x8x512xf32>
    %155 = vector.shape_cast %154 : vector<1x8x512xf32> to vector<8x512xf32>
    %cst_34 = arith.constant dense<0.000000e+00> : vector<8x512xf32>
    %156 = tpu.matmul %152, %0, %cst_34 {dimension_numbers = #tpu.dot_dimension_numbers<[1], [0], [0], [1], [0, 0, 1, 1], [], []>} : vector<8x128xf32>, vector<128x512xf32>, vector<8x512xf32> -> vector<8x512xf32>
    %157 = arith.addf %155, %156 : vector<8x512xf32>
    %158 = vector.extract_strided_slice %157 {offsets = [0, 0], sizes = [8, 128], strides = [1, 1]} : vector<8x512xf32> to vector<8x128xf32>
    %159 = arith.negf %158 : vector<8x128xf32>
    %160 = math.exp %159 : vector<8x128xf32>
    %cst_35 = arith.constant 1.000000e+00 : f32
    %161 = vector.broadcast %cst_35 : f32 to vector<8x128xf32>
    %162 = arith.addf %161, %160 : vector<8x128xf32>
    %163 = arith.divf %161, %162 : vector<8x128xf32>
    %164 = vector.extract_strided_slice %157 {offsets = [0, 128], sizes = [8, 128], strides = [1, 1]} : vector<8x512xf32> to vector<8x128xf32>
    %165 = arith.negf %164 : vector<8x128xf32>
    %166 = math.exp %165 : vector<8x128xf32>
    %cst_36 = arith.constant 1.000000e+00 : f32
    %167 = vector.broadcast %cst_36 : f32 to vector<8x128xf32>
    %168 = arith.addf %167, %166 : vector<8x128xf32>
    %169 = arith.divf %167, %168 : vector<8x128xf32>
    %170 = vector.extract_strided_slice %157 {offsets = [0, 256], sizes = [8, 128], strides = [1, 1]} : vector<8x512xf32> to vector<8x128xf32>
    %171 = math.tanh %170 : vector<8x128xf32>
    %172 = vector.extract_strided_slice %157 {offsets = [0, 384], sizes = [8, 128], strides = [1, 1]} : vector<8x512xf32> to vector<8x128xf32>
    %173 = arith.negf %172 : vector<8x128xf32>
    %174 = math.exp %173 : vector<8x128xf32>
    %cst_37 = arith.constant 1.000000e+00 : f32
    %175 = vector.broadcast %cst_37 : f32 to vector<8x128xf32>
    %176 = arith.addf %175, %174 : vector<8x128xf32>
    %177 = arith.divf %175, %176 : vector<8x128xf32>
    %178 = arith.mulf %169, %150 : vector<8x128xf32>
    %179 = arith.mulf %163, %171 : vector<8x128xf32>
    %180 = arith.addf %178, %179 : vector<8x128xf32>
    %181 = math.tanh %180 : vector<8x128xf32>
    %182 = arith.mulf %177, %181 : vector<8x128xf32>
    %c6_i32 = arith.constant 6 : i32
    %c0_38 = arith.constant 0 : index
    %c0_39 = arith.constant 0 : index
    %183 = vector.load %arg2[%c0_38, %c0_39] : memref<8x128xf32, #tpu.memory_space<vmem>>, vector<8x128xf32>
    tpu.vector_store %arg2[%c0_38, %c0_39], %182 {strides = array<i32>} : memref<8x128xf32, #tpu.memory_space<vmem>>, vector<8x128xf32>,
    %c0_40 = arith.constant 0 : index
    %c0_41 = arith.constant 0 : index
    %184 = vector.load %arg3[%c0_40, %c0_41] : memref<8x128xf32, #tpu.memory_space<vmem>>, vector<8x128xf32>
    tpu.vector_store %arg3[%c0_40, %c0_41], %180 {strides = array<i32>} : memref<8x128xf32, #tpu.memory_space<vmem>>, vector<8x128xf32>,
    return
  }
}

</mosaic_0001>

<bundles_post_ra>
// kernel: tpu_custom_call.1
= control target key start
LH: loop header
LB: loop body
LE: loop exit
PB: predicated region body
PF: predicated region fallthrough
CT: control target
= control target key end

     0   :  { %9 = vsyncpa [#allocation3], 0  ;;  %s2150_s0 = inlined_call_operand.hbm [shape: f32[6,8,512], index: 0, kind: input, shape index: {}]   ;;  %s2151_s1 = inlined_call_operand.hbm [shape: f32[128,512], index: 1, kind: input, shape index: {}]   ;;  %s2152_s2 = inlined_call_operand.hbm [shape: f32[8,128], index: 2, kind: output, shape index: {0}]   ;;  %s2153_s3 = inlined_call_operand.hbm [shape: f32[8,128], index: 3, kind: output, shape index: {1}]  }
   0x1   :  { %10 = vsyncpa [#allocation6], 0 }
   0x2   :  { %11 = vsyncpa [#allocation4], 0 }
   0x3   :  { %12 = vsyncpa [#allocation9], 0  ;;  %s1789_s12 = smov [#allocation2]   ;;  %s1693_s16 = scalar_lea.hbm %s2150_s0, 3072 }
   0x4   :  { %s18_s13 = sshll.u32 %s1789_s12, 4  ;;  %p1694_p0 = scmp.ne.s32.totalorder %s2150_s0, %s1693_s16  ;;  %s19_s13 = int_to_ptr.vmem [resolvable:$true] %s18_s13 }
   0x5   :  { %p1697_p1 = scmp.lt.u32.totalorder %s1693_s16, %s2150_s0 }
   0x7   :  { %p1699_p2 = pnand %p1697_p1, %p1694_p0 }
   0x9   :  { %1702 = shalt.err (!%p1699_p2)
}
   0xa   :  { %s1703_s21 = scalar_lea.vmem %s19_s13, 3072  ;;  %p1708_p4 = scmp.lt.s32.totalorder %s19_s13, %s19_s13 }
   0xb   :  { %p1704_p3 = scmp.ne.s32.totalorder %s19_s13, %s1703_s21  ;;  %p1709_p5 = scmp.lt.s32.totalorder %s1703_s21, %s1703_s21 }
   0xd   :  { %p1710_p6 = por %p1709_p5, %p1708_p4 }
   0xf   :  { %p1711_p7 = pnand %p1710_p6, %p1704_p3 }
  0x11   :  { %1714 = shalt.err (!%p1711_p7)
}
  0x12   :  { %s1790_s22 = smov 512   ;;  %s1791_s23 = smov 32  }
  0x13   :  { %24 = dma.hbm_to_vmem [thread:$0]  %s2150_s0, 3072, %s19_s13, [#allocation3], %s1790_s22, %s1790_s22, %s1791_s23  }
  0x14   :  { %s1792_s26 = smov [#allocation5]   ;;  %s1715_s30 = scalar_lea.hbm %s2151_s1, 8192 }
  0x15   :  { %s30_s27 = sshll.u32 %s1792_s26, 4  ;;  %p1716_p8 = scmp.ne.s32.totalorder %s2151_s1, %s1715_s30  ;;  %s31_s27 = int_to_ptr.vmem [resolvable:$true] %s30_s27 }
  0x16   :  { %p1719_p9 = scmp.lt.u32.totalorder %s1715_s30, %s2151_s1 }
  0x18   :  { %p1721_p10 = pnand %p1719_p9, %p1716_p8 }
  0x1a   :  { %1724 = shalt.err (!%p1721_p10)
}
  0x1b   :  { %s1725_s8 = scalar_lea.vmem %s31_s27, 8192  ;;  %p1730_p12 = scmp.lt.s32.totalorder %s31_s27, %s31_s27 }
  0x1c   :  { %p1726_p11 = scmp.ne.s32.totalorder %s31_s27, %s1725_s8  ;;  %p1731_p13 = scmp.lt.s32.totalorder %s1725_s8, %s1725_s8 }
  0x1e   :  { %p1732_p0 = por %p1731_p13, %p1730_p12 }
  0x20   :  { %p1733_p1 = pnand %p1732_p0, %p1726_p11 }
  0x22   :  { %1736 = shalt.err (!%p1733_p1)
}
  0x23   :  { %36 = dma.hbm_to_vmem [thread:$0]  %s2151_s1, 8192, %s31_s27, [#allocation6], %s1790_s22, %s1790_s22, %s1791_s23  }
  0x24   :  { %1781 = dma.done.wait [#allocation3], 3072  }
  0x25   :  { %1782 = vsyncadd [#allocation3], 4294964224 }
  0x26   :  { %1783 = dma.done.wait [#allocation6], 8192  }
  0x27   :  { %1784 = vsyncadd [#allocation6], 4294959104  ;;  %v1793_v0 = vmov 0.0   ;;  %v44_v1 = vld [vmem:[#allocation5 + $0x8] sm:$0xff]  ;;  %v43_v3 = vld [vmem:[#allocation5] sm:$0xff]  ;;  %s1794_s1 = smov [#allocation8]  }
  0x28   :  { %175 = vmatprep.mubr.f32.mxu0 %v1793_v0  ;;  %246 = vmatprep.mubr.f32.mxu1 %v1793_v0  ;;  %v48_v2 = vld [vmem:[#allocation5 + $0x28] sm:$0xff]  ;;  %v47_v5 = vld [vmem:[#allocation5 + $0x20] sm:$0xff]  ;;  %v46_v19 = vld [vmem:[#allocation5 + $0x18] sm:$0xff]  ;;  %s1174_s10 = sshll.u32 %s1794_s1, 4  ;;  %s1175_s10 = int_to_ptr.vmem [resolvable:$true] %s1174_s10 }
  0x29   :  { %v1842_v4 = vpack.c.bf16 %v48_v2, %v44_v1  ;;  %v52_v6 = vld [vmem:[#allocation5 + $0x48] sm:$0xff]  ;;  %v1844_v8 = vpack.c.bf16 %v47_v5, %v43_v3  ;;  %v51_v10 = vld [vmem:[#allocation5 + $0x40] sm:$0xff]  ;;  %v50_v20 = vld [vmem:[#allocation5 + $0x38] sm:$0xff]  ;;  %s1737_s11 = scalar_lea.vmem %s1175_s10, 128  ;;  %p1742_p3 = scmp.lt.s32.totalorder %s1175_s10, %s1175_s10 }
  0x2a   :  { %v56_v7 = vld [vmem:[#allocation5 + $0x68] sm:$0xff]  ;;  %v55_v11 = vld [vmem:[#allocation5 + $0x60] sm:$0xff]  ;;  %v1855_v22 = vpack.c.bf16 %v50_v20, %v46_v19  ;;  %v45_v23 = vld [vmem:[#allocation5 + $0x10] sm:$0xff]  ;;  %p1738_p2 = scmp.ne.s32.totalorder %s1175_s10, %s1737_s11  ;;  %p1743_p4 = scmp.lt.s32.totalorder %s1737_s11, %s1737_s11 }
  0x2b   :  { %v1846_v9 = vpack.c.bf16 %v56_v7, %v52_v6  ;;  %v60_v12 = vld [vmem:[#allocation5 + $0x88] sm:$0xff]  ;;  %1207 = vmatprep.subr.bf16.mxu0 %v1842_v4  ;;  %v1850_v14 = vpack.c.bf16 %v55_v11, %v51_v10  ;;  %v59_v15 = vld [vmem:[#allocation5 + $0x80] sm:$0xff]  ;;  %v49_v24 = vld [vmem:[#allocation5 + $0x30] sm:$0xff] }
  0x2c   :  { %v64_v13 = vld [vmem:[#allocation5 + $0xa8] sm:$0xff]  ;;  %1209 = vmatpush1.bf16.msra.mxu0 %v1844_v8  ;;  %v63_v16 = vld [vmem:[#allocation5 + $0xa0] sm:$0xff]  ;;  %v1857_v25 = vpack.c.bf16 %v49_v24, %v45_v23  ;;  %1239 = vmatprep.subr.bf16.mxu1 %v1855_v22  ;;  %v54_v27 = vld [vmem:[#allocation5 + $0x58] sm:$0xff]  ;;  %p1744_p5 = por %p1743_p4, %p1742_p3 }
  0x2d   :  { %1211 = vmatprep.subr.bf16.mxu0 %v1846_v9  ;;  %v1853_v17 = vpack.c.bf16 %v64_v13, %v60_v12  ;;  %v68_v18 = vld [vmem:[#allocation5 + $0xc8] sm:$0xff]  ;;  %v1860_v26 = vpack.c.bf16 %v63_v16, %v59_v15  ;;  %v58_v28 = vld [vmem:[#allocation5 + $0x78] sm:$0xff]  ;;  %v53_v29 = vld [vmem:[#allocation5 + $0x50] sm:$0xff] }
  0x2e   :  { %v72_v21 = vld [vmem:[#allocation5 + $0xe8] sm:$0xff]  ;;  %v67_v31 = vld [vmem:[#allocation5 + $0xc0] sm:$0xff]  ;;  %1241 = vmatpush1.bf16.msra.mxu1 %v1857_v25  ;;  %v1867_v33 = vpack.c.bf16 %v58_v28, %v54_v27  ;;  %v57_v34 = vld [vmem:[#allocation5 + $0x70] sm:$0xff]  ;;  %p1745_p6 = pnand %p1744_p5, %p1738_p2 }
  0x2f   :  { %v1864_v30 = vpack.c.bf16 %v72_v21, %v68_v18  ;;  %v71_v32 = vld [vmem:[#allocation5 + $0xe0] sm:$0xff]  ;;  %v76_v35 = vld [vmem:[#allocation5 + $0x108] sm:$0xff]  ;;  %v1869_v37 = vpack.c.bf16 %v57_v34, %v53_v29  ;;  %v62_v38 = vld [vmem:[#allocation5 + $0x98] sm:$0xff] }
  0x30   :  { %1213 = vmatpush1.bf16.msra.mxu0 %v1850_v14  ;;  %v80_v36 = vld [vmem:[#allocation5 + $0x128] sm:$0xff]  ;;  %1243 = vmatprep.subr.bf16.mxu1 %v1867_v33  ;;  %v66_v39 = vld [vmem:[#allocation5 + $0xb8] sm:$0xff]  ;;  %v61_v40 = vld [vmem:[#allocation5 + $0x90] sm:$0xff]  ;;  %v1873_v42 = vpack.c.bf16 %v71_v32, %v67_v31 }
  0x31   :  { %1215 = vmatprep.subr.bf16.mxu0 %v1853_v17  ;;  %v65_v41 = vld [vmem:[#allocation5 + $0xb0] sm:$0xff]  ;;  %v75_v43 = vld [vmem:[#allocation5 + $0x100] sm:$0xff]  ;;  %v1875_v45 = vpack.c.bf16 %v66_v39, %v62_v38  ;;  %v1878_v46 = vpack.c.bf16 %v80_v36, %v76_v35  ;;  %v84_v47 = vld [vmem:[#allocation5 + $0x148] sm:$0xff] }
  0x32   :  { %v79_v44 = vld [vmem:[#allocation5 + $0x120] sm:$0xff]  ;;  %1245 = vmatpush1.bf16.msra.mxu1 %v1869_v37  ;;  %v1881_v48 = vpack.c.bf16 %v65_v41, %v61_v40  ;;  %v70_v49 = vld [vmem:[#allocation5 + $0xd8] sm:$0xff]  ;;  %v88_v51 = vld [vmem:[#allocation5 + $0x168] sm:$0xff] }
  0x33   :  { %v74_v50 = vld [vmem:[#allocation5 + $0xf8] sm:$0xff]  ;;  %1247 = vmatprep.subr.bf16.mxu1 %v1875_v45  ;;  %v69_v53 = vld [vmem:[#allocation5 + $0xd0] sm:$0xff]  ;;  %v1887_v55 = vpack.c.bf16 %v79_v44, %v75_v43  ;;  %v1890_v58 = vpack.c.bf16 %v88_v51, %v84_v47  ;;  %v83_v59 = vld [vmem:[#allocation5 + $0x140] sm:$0xff] }
  0x34   :  { %1217 = vmatpush1.bf16.msra.mxu0 %v1860_v26  ;;  %v1884_v52 = vpack.c.bf16 %v74_v50, %v70_v49  ;;  %v73_v54 = vld [vmem:[#allocation5 + $0xf0] sm:$0xff]  ;;  %v78_v56 = vld [vmem:[#allocation5 + $0x118] sm:$0xff]  ;;  %v87_v60 = vld [vmem:[#allocation5 + $0x160] sm:$0xff] }
  0x35   :  { %1219 = vmatprep.subr.bf16.mxu0 %v1864_v30  ;;  %v82_v57 = vld [vmem:[#allocation5 + $0x138] sm:$0xff]  ;;  %v92_v61 = vld [vmem:[#allocation5 + $0x188] sm:$0xff]  ;;  %v1893_v62 = vpack.c.bf16 %v73_v54, %v69_v53  ;;  %v77_v2 = vld [vmem:[#allocation5 + $0x110] sm:$0xff]  ;;  %v1899_v7 = vpack.c.bf16 %v87_v60, %v83_v59 }
  0x36   :  { %1249 = vmatpush1.bf16.msra.mxu1 %v1881_v48  ;;  %v96_v63 = vld [vmem:[#allocation5 + $0x1a8] sm:$0xff]  ;;  %v1896_v1 = vpack.c.bf16 %v82_v57, %v78_v56  ;;  %v81_v3 = vld [vmem:[#allocation5 + $0x130] sm:$0xff]  ;;  %v86_v5 = vld [vmem:[#allocation5 + $0x158] sm:$0xff] }
  0x37   :  { %1251 = vmatprep.subr.bf16.mxu1 %v1884_v52  ;;  %v90_v6 = vld [vmem:[#allocation5 + $0x178] sm:$0xff]  ;;  %v1902_v10 = vpack.c.bf16 %v96_v63, %v92_v61  ;;  %v91_v11 = vld [vmem:[#allocation5 + $0x180] sm:$0xff]  ;;  %v100_v13 = vld [vmem:[#allocation5 + $0x1c8] sm:$0xff]  ;;  %v1905_v15 = vpack.c.bf16 %v81_v3, %v77_v2 }
  0x38   :  { %1221 = vmatpush1.bf16.msra.mxu0 %v1873_v42  ;;  %v95_v12 = vld [vmem:[#allocation5 + $0x1a0] sm:$0xff]  ;;  %v104_v16 = vld [vmem:[#allocation5 + $0x1e8] sm:$0xff]  ;;  %v1908_v18 = vpack.c.bf16 %v90_v6, %v86_v5  ;;  %v85_v19 = vld [vmem:[#allocation5 + $0x150] sm:$0xff] }
  0x39   :  { %1223 = vmatprep.subr.bf16.mxu0 %v1878_v46  ;;  %v89_v20 = vld [vmem:[#allocation5 + $0x170] sm:$0xff]  ;;  %v94_v21 = vld [vmem:[#allocation5 + $0x198] sm:$0xff]  ;;  %v1911_v24 = vpack.c.bf16 %v95_v12, %v91_v11  ;;  %v1914_v27 = vpack.c.bf16 %v104_v16, %v100_v13  ;;  %v99_v28 = vld [vmem:[#allocation5 + $0x1c0] sm:$0xff] }
  0x3a   :  { %1253 = vmatpush1.bf16.msra.mxu1 %v1893_v62  ;;  %v98_v23 = vld [vmem:[#allocation5 + $0x1b8] sm:$0xff]  ;;  %v103_v29 = vld [vmem:[#allocation5 + $0x1e0] sm:$0xff]  ;;  %v1917_v31 = vpack.c.bf16 %v89_v20, %v85_v19  ;;  %v93_v34 = vld [vmem:[#allocation5 + $0x190] sm:$0xff] }
  0x3b   :  { %1255 = vmatprep.subr.bf16.mxu1 %v1896_v1  ;;  %v1920_v32 = vpack.c.bf16 %v98_v23, %v94_v21  ;;  %v97_v35 = vld [vmem:[#allocation5 + $0x1b0] sm:$0xff]  ;;  %v102_v36 = vld [vmem:[#allocation5 + $0x1d8] sm:$0xff]  ;;  %v1923_v39 = vpack.c.bf16 %v103_v29, %v99_v28  ;;  %v107_v49 = vld [vmem:[#allocation2] sm:$0xff] }
  0x3c   :  { %1225 = vmatpush1.bf16.msra.mxu0 %v1887_v55  ;;  %v106_v38 = vld [vmem:[#allocation5 + $0x1f8] sm:$0xff]  ;;  %v1927_v40 = vpack.c.bf16 %v97_v35, %v93_v34  ;;  %v101_v43 = vld [vmem:[#allocation5 + $0x1d0] sm:$0xff]  ;;  %v108_v50 = vld [vmem:[#allocation2 + $0x8] sm:$0xff] }
  0x3d   :  { %1227 = vmatprep.subr.bf16.mxu0 %v1890_v58  ;;  %v1930_v41 = vpack.c.bf16 %v106_v38, %v102_v36  ;;  %v105_v44 = vld [vmem:[#allocation5 + $0x1f0] sm:$0xff]  ;;  %v110_v60 = vld [vmem:[#allocation2 + $0x18] sm:$0xff] }
  0x3e   :  { %1257 = vmatpush1.bf16.msra.mxu1 %v1905_v15  ;;  %v1934_v47 = vpack.c.bf16 %v105_v44, %v101_v43  ;;  %v109_v3 = vld [vmem:[#allocation2 + $0x10] sm:$0xff]  ;;  %v282_v44 = vld [vmem:[#allocation2 + $0x20] sm:$0xff] }
  0x3f   :  { %1259 = vmatprep.subr.bf16.mxu1 %v1908_v18 }
  0x40   :  { %1229 = vmatpush1.bf16.msra.mxu0 %v1899_v7 }
  0x41   :  { %1231 = vmatprep.subr.bf16.mxu0 %v1902_v10 }
  0x42   :  { %1261 = vmatpush1.bf16.msra.mxu1 %v1917_v31 }
  0x43   :  { %1263 = vmatprep.subr.bf16.mxu1 %v1920_v32 }
  0x44   :  { %1233 = vmatpush1.bf16.msra.mxu0 %v1911_v24 }
  0x45   :  { %1235 = vmatprep.subr.bf16.mxu0 %v1914_v27 }
  0x46   :  { %1265 = vmatpush1.bf16.msra.mxu1 %v1927_v40 }
  0x47   :  { %1267 = vmatprep.subr.bf16.mxu1 %v1930_v41 }
  0x48   :  { %1237 = vmatpush1.bf16.msra.mxu0 %v1923_v39 }
  0x49   :  { %1271 = vmatprep.subr.bf16.mxu0 %v1842_v4 }
  0x4a   :  { %1269 = vmatpush1.bf16.msra.mxu1 %v1934_v47 }
  0x4b   :  { %176 = vmatmul.mubr.f32.vlgmr.msra.gmra.mrb[0].mxu0 %v1793_v0  ;;  %1303 = vmatprep.subr.bf16.mxu1 %v1855_v22 }
  0x4c   :  { %1273 = vmatpush1.bf16.msra.mxu0 %v1844_v8  ;;  %350 = vmatprep.mubr.f32.mxu0 %v1793_v0 }
  0x4d   :  { %1275 = vmatprep.subr.bf16.mxu0 %v1846_v9  ;;  %247 = vmatmul.mubr.f32.vlgmr.msra.gmra.mrb[0].mxu1 %v1793_v0 }
  0x4e   :  { %1305 = vmatpush1.bf16.msra.mxu1 %v1857_v25  ;;  %421 = vmatprep.mubr.f32.mxu1 %v1793_v0 }
  0x4f   :  { %1307 = vmatprep.subr.bf16.mxu1 %v1867_v33 }
  0x50   :  { %1277 = vmatpush1.bf16.msra.mxu0 %v1850_v14 }
  0x51   :  { %1279 = vmatprep.subr.bf16.mxu0 %v1853_v17 }
  0x52   :  { %1309 = vmatpush1.bf16.msra.mxu1 %v1869_v37 }
  0x53   :  { %1311 = vmatprep.subr.bf16.mxu1 %v1875_v45 }
  0x54   :  { %1281 = vmatpush1.bf16.msra.mxu0 %v1860_v26 }
  0x55   :  { %1283 = vmatprep.subr.bf16.mxu0 %v1864_v30 }
  0x56   :  { %1313 = vmatpush1.bf16.msra.mxu1 %v1881_v48 }
  0x57   :  { %1315 = vmatprep.subr.bf16.mxu1 %v1884_v52 }
  0x58   :  { %1285 = vmatpush1.bf16.msra.mxu0 %v1873_v42 }
  0x59   :  { %1287 = vmatprep.subr.bf16.mxu0 %v1878_v46 }
  0x5a   :  { %1317 = vmatpush1.bf16.msra.mxu1 %v1893_v62 }
  0x5b   :  { %1319 = vmatprep.subr.bf16.mxu1 %v1896_v1 }
  0x5c   :  { %1289 = vmatpush1.bf16.msra.mxu0 %v1887_v55 }
  0x5d   :  { %1291 = vmatprep.subr.bf16.mxu0 %v1890_v58 }
  0x5e   :  { %1321 = vmatpush1.bf16.msra.mxu1 %v1905_v15 }
  0x5f   :  { %1323 = vmatprep.subr.bf16.mxu1 %v1908_v18 }
  0x60   :  { %1293 = vmatpush1.bf16.msra.mxu0 %v1899_v7 }
  0x61   :  { %1295 = vmatprep.subr.bf16.mxu0 %v1902_v10 }
  0x62   :  { %1325 = vmatpush1.bf16.msra.mxu1 %v1917_v31 }
  0x63   :  { %1327 = vmatprep.subr.bf16.mxu1 %v1920_v32 }
  0x64   :  { %1297 = vmatpush1.bf16.msra.mxu0 %v1911_v24 }
  0x65   :  { %1299 = vmatprep.subr.bf16.mxu0 %v1914_v27 }
  0x66   :  { %1329 = vmatpush1.bf16.msra.mxu1 %v1927_v40 }
  0x67   :  { %1331 = vmatprep.subr.bf16.mxu1 %v1930_v41 }
  0x68   :  { %1301 = vmatpush1.bf16.msra.mxu0 %v1923_v39 }
  0x69   :  { %1335 = vmatprep.subr.bf16.mxu0 %v1842_v4 }
  0x6a   :  { %1333 = vmatpush1.bf16.msra.mxu1 %v1934_v47 }
  0x6b   :  { %1367 = vmatprep.subr.bf16.mxu1 %v1855_v22 }
 0x11e   :  { %v177_v51 = vpop.f32.mrb[0].mxu0 }
 0x11f   :  { %v253_v53 = vadd.f32 %v177_v51, %v107_v49  ;;  %v179_v54 = vpop.f32.mrb[1].mxu0  ;;  %v283_v49 = vld [vmem:[#allocation2 + $0x28] sm:$0xff] }
 0x120   :  { %v254_v56 = vadd.f32 %v179_v54, %v108_v50  ;;  %v248_v61 = vpop.f32.mrb[0].mxu1 }
 0x121   :  { %v1188_v57 = vmul.f32 -1.442695, %v253_v53  ;;  %v250_v63 = vpop.f32.mrb[1].mxu1  ;;  %v255_v6 = vadd.f32 %v248_v61, %v109_v3  ;;  %v285_v61 = vld [vmem:[#allocation2 + $0x38] sm:$0xff] }
 0x122   :  { %v1189_v59 = vmul.f32 -1.442695, %v254_v56  ;;  %v256_v2 = vadd.f32 %v250_v63, %v110_v60 }
 0x123   :  { %1597 = vpow2.f32 %v1188_v57 }
 0x124   :  { %1599 = vpow2.f32 %v1189_v59  ;;  %v1190_v5 = vmul.f32 -1.442695, %v256_v2  ;;  %v284_v2 = vld [vmem:[#allocation2 + $0x30] sm:$0xff] }
 0x126   :  { %1601 = vpow2.f32 %v1190_v5 }
 0x127   :  { %1603 = vtanh.f32 %v255_v6 }
 0x12d   :  { %v1598_v11 = vpop.eup %1597 }
 0x12e   :  { %v1600_v12 = vpop.eup %1599  ;;  %v260_v13 = vadd.f32 1.0, %v1598_v11 }
 0x12f   :  { %v266_v16 = vadd.f32 1.0, %v1600_v12 }
 0x130   :  { %1605 = vrcp.f32 %v260_v13  ;;  %v1602_v19 = vpop.eup %1601 }
 0x131   :  { %1607 = vrcp.f32 %v266_v16  ;;  %v1604_v20 = vpop.eup %1603  ;;  %v273_v23 = vadd.f32 1.0, %v1602_v19 }
 0x133   :  { %1609 = vrcp.f32 %v273_v23 }
 0x13a   :  { %v1606_v21 = vpop.eup %1605 }
 0x13b   :  { %v1608_v28 = vpop.eup %1607  ;;  %v277_v29 = vmul.f32 %v1606_v21, %v1604_v20 }
 0x13c   :  { %v276_v34 = vmul.f32 0.0, %v1608_v28 }
 0x13d   :  { %v1610_v36 = vpop.eup %1609 }
 0x13e   :  { %v1976_v35 = vadd.f32 %v277_v29, %v276_v34 }
 0x140   :  { %1611 = vtanh.f32 %v1976_v35 }
 0x14a   :  { %v1612_v38 = vpop.eup %1611 }
 0x14b   :  { %v280_v43 = vmul.f32 %v1612_v38, %v1610_v36 }
 0x14d   :  { %351 = vmatmul.mubr.f32.vlgmr.msra.gmra.mrb[2].mxu0 %v280_v43  ;;  %422 = vmatmul.mubr.f32.vlgmr.msra.gmra.mrb[2].mxu1 %v280_v43 }
 0x14e   :  { %1337 = vmatpush1.bf16.msra.mxu0 %v1844_v8  ;;  %1369 = vmatpush1.bf16.msra.mxu1 %v1857_v25 }
 0x14f   :  { %1339 = vmatprep.subr.bf16.mxu0 %v1846_v9  ;;  %1371 = vmatprep.subr.bf16.mxu1 %v1867_v33 }
 0x150   :  { %525 = vmatprep.mubr.f32.mxu0 %v1793_v0  ;;  %596 = vmatprep.mubr.f32.mxu1 %v1793_v0 }
 0x152   :  { %1341 = vmatpush1.bf16.msra.mxu0 %v1850_v14  ;;  %1373 = vmatpush1.bf16.msra.mxu1 %v1869_v37 }
 0x153   :  { %1343 = vmatprep.subr.bf16.mxu0 %v1853_v17  ;;  %1375 = vmatprep.subr.bf16.mxu1 %v1875_v45 }
 0x156   :  { %1345 = vmatpush1.bf16.msra.mxu0 %v1860_v26  ;;  %1377 = vmatpush1.bf16.msra.mxu1 %v1881_v48 }
 0x157   :  { %1347 = vmatprep.subr.bf16.mxu0 %v1864_v30  ;;  %1379 = vmatprep.subr.bf16.mxu1 %v1884_v52 }
 0x15a   :  { %1349 = vmatpush1.bf16.msra.mxu0 %v1873_v42  ;;  %1381 = vmatpush1.bf16.msra.mxu1 %v1893_v62 }
 0x15b   :  { %1351 = vmatprep.subr.bf16.mxu0 %v1878_v46  ;;  %1383 = vmatprep.subr.bf16.mxu1 %v1896_v1 }
 0x15e   :  { %1353 = vmatpush1.bf16.msra.mxu0 %v1887_v55  ;;  %1385 = vmatpush1.bf16.msra.mxu1 %v1905_v15 }
 0x15f   :  { %1355 = vmatprep.subr.bf16.mxu0 %v1890_v58  ;;  %1387 = vmatprep.subr.bf16.mxu1 %v1908_v18 }
 0x162   :  { %1357 = vmatpush1.bf16.msra.mxu0 %v1899_v7  ;;  %1389 = vmatpush1.bf16.msra.mxu1 %v1917_v31 }
 0x163   :  { %1359 = vmatprep.subr.bf16.mxu0 %v1902_v10  ;;  %1391 = vmatprep.subr.bf16.mxu1 %v1920_v32 }
 0x166   :  { %1361 = vmatpush1.bf16.msra.mxu0 %v1911_v24  ;;  %1393 = vmatpush1.bf16.msra.mxu1 %v1927_v40 }
 0x167   :  { %1363 = vmatprep.subr.bf16.mxu0 %v1914_v27  ;;  %1395 = vmatprep.subr.bf16.mxu1 %v1930_v41 }
 0x16a   :  { %1365 = vmatpush1.bf16.msra.mxu0 %v1923_v39  ;;  %1397 = vmatpush1.bf16.msra.mxu1 %v1934_v47 }
 0x16b   :  { %1399 = vmatprep.subr.bf16.mxu0 %v1842_v4  ;;  %1431 = vmatprep.subr.bf16.mxu1 %v1855_v22 }
 0x220   :  { %v352_v50 = vpop.f32.mrb[2].mxu0  ;;  %v423_v51 = vpop.f32.mrb[2].mxu1 }
 0x221   :  { %v428_v53 = vadd.f32 %v352_v50, %v282_v44  ;;  %v354_v54 = vpop.f32.mrb[3].mxu0  ;;  %v425_v56 = vpop.f32.mrb[3].mxu1  ;;  %v430_v5 = vadd.f32 %v423_v51, %v284_v2  ;;  %v458_v44 = vld [vmem:[#allocation2 + $0x48] sm:$0xff] }
 0x222   :  { %v429_v57 = vadd.f32 %v354_v54, %v283_v49  ;;  %v431_v63 = vadd.f32 %v425_v56, %v285_v61 }
 0x223   :  { %v1191_v59 = vmul.f32 -1.442695, %v428_v53 }
 0x224   :  { %v1192_v60 = vmul.f32 -1.442695, %v429_v57  ;;  %v1193_v3 = vmul.f32 -1.442695, %v431_v63  ;;  %v459_v63 = vld [vmem:[#allocation2 + $0x50] sm:$0xff] }
 0x225   :  { %1613 = vpow2.f32 %v1191_v59 }
 0x226   :  { %1615 = vpow2.f32 %v1192_v60  ;;  %v460_v60 = vld [vmem:[#allocation2 + $0x58] sm:$0xff] }
 0x227   :  { %1617 = vpow2.f32 %v1193_v3 }
 0x228   :  { %1619 = vtanh.f32 %v430_v5 }
 0x22f   :  { %v1614_v6 = vpop.eup %1613 }
 0x230   :  { %v1616_v11 = vpop.eup %1615  ;;  %v435_v12 = vadd.f32 1.0, %v1614_v6 }
 0x231   :  { %v441_v13 = vadd.f32 1.0, %v1616_v11  ;;  %v1618_v16 = vpop.eup %1617 }
 0x232   :  { %1621 = vrcp.f32 %v435_v12  ;;  %v1620_v19 = vpop.eup %1619  ;;  %v448_v28 = vadd.f32 1.0, %v1618_v16 }
 0x233   :  { %1623 = vrcp.f32 %v441_v13 }
 0x234   :  { %1625 = vrcp.f32 %v448_v28 }
 0x23c   :  { %v1622_v20 = vpop.eup %1621 }
 0x23d   :  { %v1624_v21 = vpop.eup %1623  ;;  %v452_v23 = vmul.f32 %v1622_v20, %v1620_v19 }
 0x23e   :  { %v451_v29 = vmul.f32 %v1624_v21, %v1976_v35  ;;  %v1626_v36 = vpop.eup %1625  ;;  %v457_v35 = vld [vmem:[#allocation2 + $0x40] sm:$0xff] }
 0x240   :  { %v2014_v34 = vadd.f32 %v452_v23, %v451_v29 }
 0x242   :  { %1627 = vtanh.f32 %v2014_v34 }
 0x24c   :  { %v1628_v38 = vpop.eup %1627 }
 0x24d   :  { %v455_v43 = vmul.f32 %v1628_v38, %v1626_v36 }
 0x24f   :  { %526 = vmatmul.mubr.f32.vlgmr.msra.gmra.mrb[4].mxu0 %v455_v43  ;;  %597 = vmatmul.mubr.f32.vlgmr.msra.gmra.mrb[4].mxu1 %v455_v43 }
 0x250   :  { %1401 = vmatpush1.bf16.msra.mxu0 %v1844_v8  ;;  %1433 = vmatpush1.bf16.msra.mxu1 %v1857_v25 }
 0x251   :  { %1403 = vmatprep.subr.bf16.mxu0 %v1846_v9  ;;  %1435 = vmatprep.subr.bf16.mxu1 %v1867_v33 }
 0x252   :  { %700 = vmatprep.mubr.f32.mxu0 %v1793_v0  ;;  %771 = vmatprep.mubr.f32.mxu1 %v1793_v0 }
 0x254   :  { %1405 = vmatpush1.bf16.msra.mxu0 %v1850_v14  ;;  %1437 = vmatpush1.bf16.msra.mxu1 %v1869_v37 }
 0x255   :  { %1407 = vmatprep.subr.bf16.mxu0 %v1853_v17  ;;  %1439 = vmatprep.subr.bf16.mxu1 %v1875_v45 }
 0x258   :  { %1409 = vmatpush1.bf16.msra.mxu0 %v1860_v26  ;;  %1441 = vmatpush1.bf16.msra.mxu1 %v1881_v48 }
 0x259   :  { %1411 = vmatprep.subr.bf16.mxu0 %v1864_v30  ;;  %1443 = vmatprep.subr.bf16.mxu1 %v1884_v52 }
 0x25c   :  { %1413 = vmatpush1.bf16.msra.mxu0 %v1873_v42  ;;  %1445 = vmatpush1.bf16.msra.mxu1 %v1893_v62 }
 0x25d   :  { %1415 = vmatprep.subr.bf16.mxu0 %v1878_v46  ;;  %1447 = vmatprep.subr.bf16.mxu1 %v1896_v1 }
 0x260   :  { %1417 = vmatpush1.bf16.msra.mxu0 %v1887_v55  ;;  %1449 = vmatpush1.bf16.msra.mxu1 %v1905_v15 }
 0x261   :  { %1419 = vmatprep.subr.bf16.mxu0 %v1890_v58  ;;  %1451 = vmatprep.subr.bf16.mxu1 %v1908_v18 }
 0x264   :  { %1421 = vmatpush1.bf16.msra.mxu0 %v1899_v7  ;;  %1453 = vmatpush1.bf16.msra.mxu1 %v1917_v31 }
 0x265   :  { %1423 = vmatprep.subr.bf16.mxu0 %v1902_v10  ;;  %1455 = vmatprep.subr.bf16.mxu1 %v1920_v32 }
 0x268   :  { %1425 = vmatpush1.bf16.msra.mxu0 %v1911_v24  ;;  %1457 = vmatpush1.bf16.msra.mxu1 %v1927_v40 }
 0x269   :  { %1427 = vmatprep.subr.bf16.mxu0 %v1914_v27  ;;  %1459 = vmatprep.subr.bf16.mxu1 %v1930_v41 }
 0x26c   :  { %1429 = vmatpush1.bf16.msra.mxu0 %v1923_v39  ;;  %1461 = vmatpush1.bf16.msra.mxu1 %v1934_v47 }
 0x26d   :  { %1463 = vmatprep.subr.bf16.mxu0 %v1842_v4  ;;  %1495 = vmatprep.subr.bf16.mxu1 %v1855_v22 }
 0x322   :  { %v527_v49 = vpop.f32.mrb[4].mxu0  ;;  %v598_v50 = vpop.f32.mrb[4].mxu1 }
 0x323   :  { %v603_v51 = vadd.f32 %v527_v49, %v457_v35  ;;  %v529_v53 = vpop.f32.mrb[5].mxu0  ;;  %v600_v54 = vpop.f32.mrb[5].mxu1  ;;  %v605_v3 = vadd.f32 %v598_v50, %v459_v63  ;;  %v633_v35 = vld [vmem:[#allocation2 + $0x68] sm:$0xff] }
 0x324   :  { %v604_v56 = vadd.f32 %v529_v53, %v458_v44  ;;  %v606_v61 = vadd.f32 %v600_v54, %v460_v60 }
 0x325   :  { %v1194_v57 = vmul.f32 -1.442695, %v603_v51 }
 0x326   :  { %v1195_v59 = vmul.f32 -1.442695, %v604_v56  ;;  %v1196_v2 = vmul.f32 -1.442695, %v606_v61  ;;  %v634_v61 = vld [vmem:[#allocation2 + $0x70] sm:$0xff] }
 0x327   :  { %1629 = vpow2.f32 %v1194_v57 }
 0x328   :  { %1631 = vpow2.f32 %v1195_v59  ;;  %v635_v59 = vld [vmem:[#allocation2 + $0x78] sm:$0xff] }
 0x329   :  { %1633 = vpow2.f32 %v1196_v2 }
 0x32a   :  { %1635 = vtanh.f32 %v605_v3 }
 0x331   :  { %v1630_v5 = vpop.eup %1629 }
 0x332   :  { %v1632_v6 = vpop.eup %1631  ;;  %v610_v11 = vadd.f32 1.0, %v1630_v5 }
 0x333   :  { %v616_v12 = vadd.f32 1.0, %v1632_v6  ;;  %v1634_v13 = vpop.eup %1633 }
 0x334   :  { %1637 = vrcp.f32 %v610_v11  ;;  %v1636_v16 = vpop.eup %1635  ;;  %v623_v23 = vadd.f32 1.0, %v1634_v13 }
 0x335   :  { %1639 = vrcp.f32 %v616_v12 }
 0x336   :  { %1641 = vrcp.f32 %v623_v23 }
 0x33e   :  { %v1638_v19 = vpop.eup %1637 }
 0x33f   :  { %v1640_v20 = vpop.eup %1639  ;;  %v627_v21 = vmul.f32 %v1638_v19, %v1636_v16 }
 0x340   :  { %v626_v28 = vmul.f32 %v1640_v20, %v2014_v34  ;;  %v1642_v36 = vpop.eup %1641  ;;  %v632_v34 = vld [vmem:[#allocation2 + $0x60] sm:$0xff] }
 0x342   :  { %v2052_v29 = vadd.f32 %v627_v21, %v626_v28 }
 0x344   :  { %1643 = vtanh.f32 %v2052_v29 }
 0x34e   :  { %v1644_v38 = vpop.eup %1643 }
 0x34f   :  { %v630_v43 = vmul.f32 %v1644_v38, %v1642_v36 }
 0x351   :  { %701 = vmatmul.mubr.f32.vlgmr.msra.gmra.mrb[6].mxu0 %v630_v43  ;;  %772 = vmatmul.mubr.f32.vlgmr.msra.gmra.mrb[6].mxu1 %v630_v43 }
 0x352   :  { %1465 = vmatpush1.bf16.msra.mxu0 %v1844_v8  ;;  %1497 = vmatpush1.bf16.msra.mxu1 %v1857_v25 }
 0x353   :  { %1467 = vmatprep.subr.bf16.mxu0 %v1846_v9  ;;  %1499 = vmatprep.subr.bf16.mxu1 %v1867_v33 }
 0x354   :  { %875 = vmatprep.mubr.f32.mxu0 %v1793_v0  ;;  %946 = vmatprep.mubr.f32.mxu1 %v1793_v0 }
 0x356   :  { %1469 = vmatpush1.bf16.msra.mxu0 %v1850_v14  ;;  %1501 = vmatpush1.bf16.msra.mxu1 %v1869_v37 }
 0x357   :  { %1471 = vmatprep.subr.bf16.mxu0 %v1853_v17  ;;  %1503 = vmatprep.subr.bf16.mxu1 %v1875_v45 }
 0x35a   :  { %1473 = vmatpush1.bf16.msra.mxu0 %v1860_v26  ;;  %1505 = vmatpush1.bf16.msra.mxu1 %v1881_v48 }
 0x35b   :  { %1475 = vmatprep.subr.bf16.mxu0 %v1864_v30  ;;  %1507 = vmatprep.subr.bf16.mxu1 %v1884_v52 }
 0x35e   :  { %1477 = vmatpush1.bf16.msra.mxu0 %v1873_v42  ;;  %1509 = vmatpush1.bf16.msra.mxu1 %v1893_v62 }
 0x35f   :  { %1479 = vmatprep.subr.bf16.mxu0 %v1878_v46  ;;  %1511 = vmatprep.subr.bf16.mxu1 %v1896_v1 }
 0x362   :  { %1481 = vmatpush1.bf16.msra.mxu0 %v1887_v55  ;;  %1513 = vmatpush1.bf16.msra.mxu1 %v1905_v15 }
 0x363   :  { %1483 = vmatprep.subr.bf16.mxu0 %v1890_v58  ;;  %1515 = vmatprep.subr.bf16.mxu1 %v1908_v18 }
 0x366   :  { %1485 = vmatpush1.bf16.msra.mxu0 %v1899_v7  ;;  %1517 = vmatpush1.bf16.msra.mxu1 %v1917_v31 }
 0x367   :  { %1487 = vmatprep.subr.bf16.mxu0 %v1902_v10  ;;  %1519 = vmatprep.subr.bf16.mxu1 %v1920_v32 }
 0x36a   :  { %1489 = vmatpush1.bf16.msra.mxu0 %v1911_v24  ;;  %1521 = vmatpush1.bf16.msra.mxu1 %v1927_v40 }
 0x36b   :  { %1491 = vmatprep.subr.bf16.mxu0 %v1914_v27  ;;  %1523 = vmatprep.subr.bf16.mxu1 %v1930_v41 }
 0x36e   :  { %1493 = vmatpush1.bf16.msra.mxu0 %v1923_v39  ;;  %1525 = vmatpush1.bf16.msra.mxu1 %v1934_v47 }
 0x36f   :  { %1527 = vmatprep.subr.bf16.mxu0 %v1842_v4  ;;  %1559 = vmatprep.subr.bf16.mxu1 %v1855_v22 }
 0x424   :  { %v702_v44 = vpop.f32.mrb[6].mxu0  ;;  %v773_v49 = vpop.f32.mrb[6].mxu1 }
 0x425   :  { %v778_v50 = vadd.f32 %v702_v44, %v632_v34  ;;  %v704_v51 = vpop.f32.mrb[7].mxu0  ;;  %v775_v53 = vpop.f32.mrb[7].mxu1  ;;  %v780_v2 = vadd.f32 %v773_v49, %v634_v61 }
 0x426   :  { %v779_v54 = vadd.f32 %v704_v51, %v633_v35  ;;  %v781_v60 = vadd.f32 %v775_v53, %v635_v59  ;;  %v985_v53 = vld [vmem:[#allocation2 + $0xb8] sm:$0xff] }
 0x427   :  { %v1197_v56 = vmul.f32 -1.442695, %v778_v50 }
 0x428   :  { %v1198_v57 = vmul.f32 -1.442695, %v779_v54  ;;  %v1199_v63 = vmul.f32 -1.442695, %v781_v60 }
 0x429   :  { %1645 = vpow2.f32 %v1197_v56  ;;  %v984_v56 = vld [vmem:[#allocation2 + $0xb0] sm:$0xff] }
 0x42a   :  { %1647 = vpow2.f32 %v1198_v57 }
 0x42b   :  { %1649 = vpow2.f32 %v1199_v63 }
 0x42c   :  { %1651 = vtanh.f32 %v780_v2 }
 0x433   :  { %v1646_v4 = vpop.eup %1645 }
 0x434   :  { %v1648_v3 = vpop.eup %1647  ;;  %v785_v22 = vadd.f32 1.0, %v1646_v4 }
 0x435   :  { %v791_v5 = vadd.f32 1.0, %v1648_v3  ;;  %v1650_v6 = vpop.eup %1649 }
 0x436   :  { %1653 = vrcp.f32 %v785_v22  ;;  %v1652_v11 = vpop.eup %1651  ;;  %v798_v19 = vadd.f32 1.0, %v1650_v6 }
 0x437   :  { %1655 = vrcp.f32 %v791_v5 }
 0x438   :  { %1657 = vrcp.f32 %v798_v19 }
 0x440   :  { %v1654_v12 = vpop.eup %1653 }
 0x441   :  { %v1656_v13 = vpop.eup %1655  ;;  %v802_v16 = vmul.f32 %v1654_v12, %v1652_v11 }
 0x442   :  { %v801_v20 = vmul.f32 %v1656_v13, %v2052_v29  ;;  %v1658_v23 = vpop.eup %1657  ;;  %v983_v29 = vld [vmem:[#allocation2 + $0xa8] sm:$0xff] }
 0x444   :  { %v2090_v21 = vadd.f32 %v802_v16, %v801_v20 }
 0x446   :  { %1659 = vtanh.f32 %v2090_v21 }
 0x450   :  { %v1660_v28 = vpop.eup %1659 }
 0x451   :  { %v805_v36 = vmul.f32 %v1660_v28, %v1658_v23 }
 0x453   :  { %876 = vmatmul.mubr.f32.vlgmr.msra.gmra.mrb[8].mxu0 %v805_v36  ;;  %947 = vmatmul.mubr.f32.vlgmr.msra.gmra.mrb[8].mxu1 %v805_v36 }
 0x454   :  { %1529 = vmatpush1.bf16.msra.mxu0 %v1844_v8  ;;  %1561 = vmatpush1.bf16.msra.mxu1 %v1857_v25  ;;  %v808_v8 = vld [vmem:[#allocation2 + $0x88] sm:$0xff] }
 0x455   :  { %1531 = vmatprep.subr.bf16.mxu0 %v1846_v9  ;;  %1563 = vmatprep.subr.bf16.mxu1 %v1867_v33 }
 0x456   :  { %1050 = vmatprep.mubr.f32.mxu0 %v1793_v0  ;;  %1121 = vmatprep.mubr.f32.mxu1 %v1793_v0  ;;  %v807_v0 = vld [vmem:[#allocation2 + $0x80] sm:$0xff] }
 0x458   :  { %1533 = vmatpush1.bf16.msra.mxu0 %v1850_v14  ;;  %1565 = vmatpush1.bf16.msra.mxu1 %v1869_v37 }
 0x459   :  { %1535 = vmatprep.subr.bf16.mxu0 %v1853_v17  ;;  %1567 = vmatprep.subr.bf16.mxu1 %v1875_v45 }
 0x45c   :  { %1537 = vmatpush1.bf16.msra.mxu0 %v1860_v26  ;;  %1569 = vmatpush1.bf16.msra.mxu1 %v1881_v48 }
 0x45d   :  { %1539 = vmatprep.subr.bf16.mxu0 %v1864_v30  ;;  %1571 = vmatprep.subr.bf16.mxu1 %v1884_v52 }
 0x460   :  { %1541 = vmatpush1.bf16.msra.mxu0 %v1873_v42  ;;  %1573 = vmatpush1.bf16.msra.mxu1 %v1893_v62  ;;  %v810_v42 = vld [vmem:[#allocation2 + $0x98] sm:$0xff] }
 0x461   :  { %1543 = vmatprep.subr.bf16.mxu0 %v1878_v46  ;;  %1575 = vmatprep.subr.bf16.mxu1 %v1896_v1  ;;  %v809_v46 = vld [vmem:[#allocation2 + $0x90] sm:$0xff] }
 0x464   :  { %1545 = vmatpush1.bf16.msra.mxu0 %v1887_v55  ;;  %1577 = vmatpush1.bf16.msra.mxu1 %v1905_v15 }
 0x465   :  { %1547 = vmatprep.subr.bf16.mxu0 %v1890_v58  ;;  %1579 = vmatprep.subr.bf16.mxu1 %v1908_v18 }
 0x468   :  { %1549 = vmatpush1.bf16.msra.mxu0 %v1899_v7  ;;  %1581 = vmatpush1.bf16.msra.mxu1 %v1917_v31 }
 0x469   :  { %1551 = vmatprep.subr.bf16.mxu0 %v1902_v10  ;;  %1583 = vmatprep.subr.bf16.mxu1 %v1920_v32 }
 0x46c   :  { %1553 = vmatpush1.bf16.msra.mxu0 %v1911_v24  ;;  %1585 = vmatpush1.bf16.msra.mxu1 %v1927_v40 }
 0x46d   :  { %1555 = vmatprep.subr.bf16.mxu0 %v1914_v27  ;;  %1587 = vmatprep.subr.bf16.mxu1 %v1930_v41 }
 0x470   :  { %1557 = vmatpush1.bf16.msra.mxu0 %v1923_v39  ;;  %1589 = vmatpush1.bf16.msra.mxu1 %v1934_v47  ;;  %v982_v47 = vld [vmem:[#allocation2 + $0xa0] sm:$0xff] }
 0x526   :  { %v877_v9 = vpop.f32.mrb[8].mxu0  ;;  %v948_v14 = vpop.f32.mrb[8].mxu1 }
 0x527   :  { %v953_v17 = vadd.f32 %v877_v9, %v807_v0  ;;  %v879_v25 = vpop.f32.mrb[9].mxu0  ;;  %v950_v26 = vpop.f32.mrb[9].mxu1  ;;  %v955_v52 = vadd.f32 %v948_v14, %v809_v46 }
 0x528   :  { %v954_v30 = vadd.f32 %v879_v25, %v808_v8  ;;  %v956_v45 = vadd.f32 %v950_v26, %v810_v42 }
 0x529   :  { %v1200_v33 = vmul.f32 -1.442695, %v953_v17 }
 0x52a   :  { %v1201_v37 = vmul.f32 -1.442695, %v954_v30  ;;  %v1202_v48 = vmul.f32 -1.442695, %v956_v45 }
 0x52b   :  { %1661 = vpow2.f32 %v1200_v33 }
 0x52c   :  { %1663 = vpow2.f32 %v1201_v37 }
 0x52d   :  { %1665 = vpow2.f32 %v1202_v48 }
 0x52e   :  { %1667 = vtanh.f32 %v955_v52 }
 0x535   :  { %v1662_v55 = vpop.eup %1661 }
 0x536   :  { %v1664_v58 = vpop.eup %1663  ;;  %v960_v62 = vadd.f32 1.0, %v1662_v55 }
 0x537   :  { %v966_v1 = vadd.f32 1.0, %v1664_v58  ;;  %v1666_v7 = vpop.eup %1665 }
 0x538   :  { %1669 = vrcp.f32 %v960_v62  ;;  %v1668_v10 = vpop.eup %1667  ;;  %v973_v27 = vadd.f32 1.0, %v1666_v7 }
 0x539   :  { %1671 = vrcp.f32 %v966_v1 }
 0x53a   :  { %1673 = vrcp.f32 %v973_v27 }
 0x542   :  { %v1670_v15 = vpop.eup %1669 }
 0x543   :  { %v1672_v18 = vpop.eup %1671  ;;  %v977_v24 = vmul.f32 %v1670_v15, %v1668_v10 }
 0x544   :  { %v976_v31 = vmul.f32 %v1672_v18, %v2090_v21  ;;  %v1674_v39 = vpop.eup %1673 }
 0x546   :  { %v978_v32 = vadd.f32 %v977_v24, %v976_v31 }
 0x548   :  { %1675 = vtanh.f32 %v978_v32 }
 0x552   :  { %v1676_v40 = vpop.eup %1675 }
 0x553   :  { %v980_v41 = vmul.f32 %v1676_v40, %v1674_v39 }
 0x555   :  { %1051 = vmatmul.mubr.f32.vlgmr.msra.gmra.mrb[10].mxu0 %v980_v41  ;;  %1122 = vmatmul.mubr.f32.vlgmr.msra.gmra.mrb[10].mxu1 %v980_v41 }
 0x628   :  { %v1052_v38 = vpop.f32.mrb[10].mxu0  ;;  %v1123_v43 = vpop.f32.mrb[10].mxu1 }
 0x629   :  { %v1128_v34 = vadd.f32 %v1052_v38, %v982_v47  ;;  %v1054_v35 = vpop.f32.mrb[11].mxu0  ;;  %v1125_v44 = vpop.f32.mrb[11].mxu1  ;;  %v1130_v59 = vadd.f32 %v1123_v43, %v984_v56 }
 0x62a   :  { %v1129_v49 = vadd.f32 %v1054_v35, %v983_v29  ;;  %v1131_v54 = vadd.f32 %v1125_v44, %v985_v53 }
 0x62b   :  { %v1203_v50 = vmul.f32 -1.442695, %v1128_v34 }
 0x62c   :  { %v1204_v51 = vmul.f32 -1.442695, %v1129_v49  ;;  %v1205_v57 = vmul.f32 -1.442695, %v1131_v54 }
 0x62d   :  { %1677 = vpow2.f32 %v1203_v50 }
 0x62e   :  { %1679 = vpow2.f32 %v1204_v51 }
 0x62f   :  { %1681 = vpow2.f32 %v1205_v57 }
 0x630   :  { %1683 = vtanh.f32 %v1130_v59 }
 0x637   :  { %v1678_v60 = vpop.eup %1677 }
 0x638   :  { %v1680_v61 = vpop.eup %1679  ;;  %v1135_v63 = vadd.f32 1.0, %v1678_v60 }
 0x639   :  { %v1141_v2 = vadd.f32 1.0, %v1680_v61  ;;  %v1682_v4 = vpop.eup %1681 }
 0x63a   :  { %1685 = vrcp.f32 %v1135_v63  ;;  %v1684_v3 = vpop.eup %1683  ;;  %v1148_v11 = vadd.f32 1.0, %v1682_v4 }
 0x63b   :  { %1687 = vrcp.f32 %v1141_v2 }
 0x63c   :  { %1689 = vrcp.f32 %v1148_v11 }
 0x644   :  { %v1686_v22 = vpop.eup %1685 }
 0x645   :  { %v1688_v5 = vpop.eup %1687  ;;  %v1152_v6 = vmul.f32 %v1686_v22, %v1684_v3 }
 0x646   :  { %v1151_v12 = vmul.f32 %v1688_v5, %v978_v32 }
 0x648   :  { %v1153_v13 = vadd.f32 %v1152_v6, %v1151_v12 }
 0x64a   :  { %1691 = vtanh.f32 %v1153_v13  ;;  %1157 = vst [vmem:[#allocation8] sm:$0xff] %v1153_v13 }
 0x64b   :  { %1748 = shalt.err (!%p1745_p6)
}
 0x64c   :  { %s1749_s14 = scalar_lea.hbm %s2153_s3, 128 }
 0x64d   :  { %p1750_p7 = scmp.ne.s32.totalorder %s2153_s3, %s1749_s14  ;;  %p1753_p8 = scmp.lt.u32.totalorder %s1749_s14, %s2153_s3 }
 0x64f   :  { %p1755_p9 = pnand %p1753_p8, %p1750_p7 }
 0x651   :  { %1758 = shalt.err (!%p1755_p9)
}
 0x652   :  { %1177 = dma.vmem_to_hbm [thread:$0]  %s1175_s10, 128, %s2153_s3, [#allocation9]   ;;  %v1690_v16 = vpop.eup %1689 }
 0x653   :  { %s1795_s21 = smov [#allocation7]  }
 0x654   :  { %s1164_s22 = sshll.u32 %s1795_s21, 4  ;;  %v1692_v19 = vpop.eup %1691  ;;  %s1165_s22 = int_to_ptr.vmem [resolvable:$true] %s1164_s22 }
 0x655   :  { %v1155_v20 = vmul.f32 %v1692_v19, %v1690_v16  ;;  %s1759_s23 = scalar_lea.vmem %s1165_s22, 128  ;;  %p1764_p11 = scmp.lt.s32.totalorder %s1165_s22, %s1165_s22 }
 0x656   :  { %p1760_p10 = scmp.ne.s32.totalorder %s1165_s22, %s1759_s23  ;;  %p1765_p12 = scmp.lt.s32.totalorder %s1759_s23, %s1759_s23 }
 0x657   :  { %1156 = vst [vmem:[#allocation7] sm:$0xff] %v1155_v20 }
 0x658   :  { %p1766_p13 = por %p1765_p12, %p1764_p11 }
 0x65a   :  { %p1767_p0 = pnand %p1766_p13, %p1760_p10 }
 0x65c   :  { %1770 = shalt.err (!%p1767_p0)
}
 0x65d   :  { %s1771_s26 = scalar_lea.hbm %s2152_s2, 128 }
 0x65e   :  { %p1772_p1 = scmp.ne.s32.totalorder %s2152_s2, %s1771_s26  ;;  %p1775_p2 = scmp.lt.u32.totalorder %s1771_s26, %s2152_s2 }
 0x660   :  { %p1777_p3 = pnand %p1775_p2, %p1772_p1 }
 0x662   :  { %1780 = shalt.err (!%p1777_p3)
}
 0x663   :  { %1167 = dma.vmem_to_hbm [thread:$0]  %s1165_s22, 128, %s2152_s2, [#allocation4]  }
 0x664   :  { %1785 = dma.done.wait [#allocation4], 128  }
 0x665   :  { %1786 = vsyncadd [#allocation4], 4294967168 }
 0x666   :  { %1787 = dma.done.wait [#allocation9], 128  }
 0x667   :  { %1788 = vsyncadd [#allocation9], 4294967168 }
 0x668   :  { %1184 = vsyncpa [#allocation3], 1 }
 0x669   :  { %1185 = vsyncpa [#allocation6], 1 }
 0x66a   :  { %1186 = vsyncpa [#allocation4], 1 }
 0x66b   :  { %1187 = vsyncpa [#allocation9], 1 }

</bundles_post_ra>
